<compile_context>
chip_gen: v7x
topology: tpu7x:2x2x1
jax: 0.10.0
libtpu: 0.0.40
codegen_flags: <defaults>
</compile_context>

<pallas_src>
import jax
import jax.numpy as jnp
from jax.experimental import pallas as pl
from jax.experimental.pallas import tpu as pltpu


LANE = 128          # lane width (last-dim alignment)
SUBLANE_BF16 = 16   # sublane packing for bf16 (second-to-last-dim alignment)


def _round_up(n, m):
    return ((n + m - 1) // m) * m


def autoencoder_kernel(x_ref,
                       w1_ref, b1_ref,
                       w2_ref, b2_ref,
                       w3_ref, b3_ref,
                       w4_ref, b4_ref,
                       o_ref):
    """Fused 4x (matmul + bias) with ReLU after the second Linear.

    x / weights are bf16 (MXU-native); accumulation and biases are f32.
    One grid step processes one batch tile; weights stay VMEM-resident.
    """
    x = x_ref[...]  # bf16 [TB, D_in_pad]

    # encoder: Linear(input_dim -> encoding_dim)
    h = jnp.dot(x, w1_ref[...], preferred_element_type=jnp.float32) + b1_ref[...]
    # encoder: Linear(encoding_dim -> encoding_dim // 2)
    h = jnp.dot(h.astype(jnp.bfloat16), w2_ref[...],
                preferred_element_type=jnp.float32) + b2_ref[...]
    # encoder: ReLU
    h = jnp.maximum(h, 0.0)
    # decoder: Linear(encoding_dim // 2 -> encoding_dim)
    h = jnp.dot(h.astype(jnp.bfloat16), w3_ref[...],
                preferred_element_type=jnp.float32) + b3_ref[...]
    # decoder: Linear(encoding_dim -> input_dim)
    out = jnp.dot(h.astype(jnp.bfloat16), w4_ref[...],
                  preferred_element_type=jnp.float32) + b4_ref[...]

    o_ref[...] = out.astype(o_ref.dtype)


def autoencoder_forward(x, params, *, batch_tile=512):
    """x: [B, input_dim] float32; params: dict of (w, b) for the 4 Linears.

    Weights are stored as [in, out] (already transposed w.r.t. PyTorch, which
    stores [out, in] and computes x @ W.T + b); biases are [1, out].
    """
    (w1, b1), (w2, b2), (w3, b3), (w4, b4) = (
        params["enc1"], params["enc2"], params["dec1"], params["dec2"])

    B, input_dim = x.shape
    encoding_dim = w1.shape[1]
    half_dim = w2.shape[1]

    # ---- pad feature dims to lane multiples (exact: padded lanes stay 0) ----
    d_in = _round_up(input_dim, LANE)
    d_enc = _round_up(encoding_dim, LANE)
    d_half = _round_up(half_dim, LANE)

    # ---- batch tile: multiple of bf16 sublane packing, capped by batch ----
    tb = min(batch_tile, _round_up(B, SUBLANE_BF16))
    tb = max(_round_up(tb, SUBLANE_BF16), SUBLANE_BF16)
    b_pad = _round_up(B, tb)
    n_tiles = pl.cdiv(b_pad, tb)

    def pad2(a, rows, cols, dtype):
        out = jnp.zeros((rows, cols), dtype)
        return out.at[:a.shape[0], :a.shape[1]].set(a.astype(dtype))

    xp = pad2(x, b_pad, d_in, jnp.bfloat16)
    w1p = pad2(w1, d_in, d_enc, jnp.bfloat16)
    w2p = pad2(w2, d_enc, d_half, jnp.bfloat16)
    w3p = pad2(w3, d_half, d_enc, jnp.bfloat16)
    w4p = pad2(w4, d_enc, d_in, jnp.bfloat16)
    b1p = pad2(b1, 1, d_enc, jnp.float32)
    b2p = pad2(b2, 1, d_half, jnp.float32)
    b3p = pad2(b3, 1, d_enc, jnp.float32)
    b4p = pad2(b4, 1, d_in, jnp.float32)

    # streaming x / out tiles; weights & biases resident across all grid steps
    stream = lambda shape: pl.BlockSpec(shape, lambda i: (i, 0))
    resident = lambda arr: pl.BlockSpec(arr.shape, lambda i: (0, 0))

    flops = 2 * b_pad * (d_in * d_enc + d_enc * d_half + d_half * d_enc + d_enc * d_in)
    bytes_accessed = (
        xp.size * xp.dtype.itemsize
        + b_pad * d_in * 4  # f32 output
        + sum(a.size * a.dtype.itemsize
              for a in (w1p, w2p, w3p, w4p, b1p, b2p, b3p, b4p)))

    out_padded = pl.pallas_call(
        autoencoder_kernel,
        out_shape=jax.ShapeDtypeStruct((b_pad, d_in), jnp.float32),
        grid=(n_tiles,),
        in_specs=[stream((tb, d_in)),
                  resident(w1p), resident(b1p),
                  resident(w2p), resident(b2p),
                  resident(w3p), resident(b3p),
                  resident(w4p), resident(b4p)],
        out_specs=stream((tb, d_in)),
        compiler_params=pltpu.CompilerParams(
            dimension_semantics=("parallel",),   # megacore sharding on v7x
            vmem_limit_bytes=32 * 1024 * 1024),  # safe on v7x's 64 MiB VMEM
        cost_estimate=pl.CostEstimate(
            flops=flops, transcendentals=0, bytes_accessed=bytes_accessed),
    )(xp, w1p, b1p, w2p, b2p, w3p, b3p, w4p, b4p)

    return out_padded[:B, :input_dim].astype(x.dtype)


def init_linear(key, fan_in, fan_out):
    """Deterministic init matching PyTorch nn.Linear defaults:
    U(-1/sqrt(fan_in), 1/sqrt(fan_in)) for weight and bias.
    Weight returned as [fan_in, fan_out] (transposed for x @ W)."""
    kw, kb = jax.random.split(key)
    bound = 1.0 / jnp.sqrt(jnp.float32(fan_in))
    w = jax.random.uniform(kw, (fan_in, fan_out), jnp.float32, -bound, bound)
    b = jax.random.uniform(kb, (1, fan_out), jnp.float32, -bound, bound)
    return w, b


def make_params(key, input_dim, encoding_dim):
    k1, k2, k3, k4 = jax.random.split(key, 4)
    half = encoding_dim // 2
    return {
        "enc1": init_linear(k1, input_dim, encoding_dim),
        "enc2": init_linear(k2, encoding_dim, half),
        "dec1": init_linear(k3, half, encoding_dim),
        "dec2": init_linear(k4, encoding_dim, input_dim),
    }


def reference_forward(x, params):
    """Pure-JAX reference mimicking the kernel's mixed precision
    (bf16 operands, f32 accumulation)."""
    (w1, b1), (w2, b2), (w3, b3), (w4, b4) = (
        params["enc1"], params["enc2"], params["dec1"], params["dec2"])
    bf = jnp.bfloat16
    h = jnp.dot(x.astype(bf), w1.astype(bf),
                preferred_element_type=jnp.float32) + b1
    h = jnp.dot(h.astype(bf), w2.astype(bf),
                preferred_element_type=jnp.float32) + b2
    h = jnp.maximum(h, 0.0)
    h = jnp.dot(h.astype(bf), w3.astype(bf),
                preferred_element_type=jnp.float32) + b3
    return jnp.dot(h.astype(bf), w4.astype(bf),
                   preferred_element_type=jnp.float32) + b4


if __name__ == "__main__":
    key = jax.random.PRNGKey(0)
    kx, kp = jax.random.split(key)

    batch = 8
    input_dim = 64
    encoding_dim = 32

    x = jax.random.normal(kx, (batch, input_dim), jnp.float32)
    params = make_params(kp, input_dim, encoding_dim)

    out = autoencoder_forward(x, params)
    out = jax.block_until_ready(out)

    ref = reference_forward(x, params)
    assert out.shape == (batch, input_dim)
    assert jnp.allclose(out, ref, atol=2e-2, rtol=2e-2), "mismatch vs. JAX reference"

    print("KERNEL_OK")
</pallas_src>

<mosaic_0001>
module attributes {stable_mosaic.version = 11 : i64} {
  func.func @autoencoder_kernel(%arg0: i32, %arg1: memref<16x128xbf16, #tpu.memory_space<vmem>>, %arg2: memref<128x128xbf16, #tpu.memory_space<vmem>>, %arg3: memref<1x128xf32, #tpu.memory_space<vmem>>, %arg4: memref<128x128xbf16, #tpu.memory_space<vmem>>, %arg5: memref<1x128xf32, #tpu.memory_space<vmem>>, %arg6: memref<128x128xbf16, #tpu.memory_space<vmem>>, %arg7: memref<1x128xf32, #tpu.memory_space<vmem>>, %arg8: memref<128x128xbf16, #tpu.memory_space<vmem>>, %arg9: memref<1x128xf32, #tpu.memory_space<vmem>>, %arg10: memref<16x128xf32, #tpu.memory_space<vmem>>) attributes {dimension_semantics = [#tpu.dimension_semantics<parallel>], iteration_bounds = array<i64: 1>, scalar_prefetch = 0 : i64, scratch_operands = 0 : i64, tpu.core_type = #tpu.core_type<tc>, window_params = [{transform_indices = @transform_0, window_bounds = array<i64: 16, 128>}, {pipeline_mode = #tpu.pipeline_mode<synchronous>, transform_indices = @transform_1, window_bounds = array<i64: 128, 128>}, {pipeline_mode = #tpu.pipeline_mode<synchronous>, transform_indices = @transform_2, window_bounds = array<i64: 1, 128>}, {pipeline_mode = #tpu.pipeline_mode<synchronous>, transform_indices = @transform_3, window_bounds = array<i64: 128, 128>}, {pipeline_mode = #tpu.pipeline_mode<synchronous>, transform_indices = @transform_4, window_bounds = array<i64: 1, 128>}, {pipeline_mode = #tpu.pipeline_mode<synchronous>, transform_indices = @transform_5, window_bounds = array<i64: 128, 128>}, {pipeline_mode = #tpu.pipeline_mode<synchronous>, transform_indices = @transform_6, window_bounds = array<i64: 1, 128>}, {pipeline_mode = #tpu.pipeline_mode<synchronous>, transform_indices = @transform_7, window_bounds = array<i64: 128, 128>}, {pipeline_mode = #tpu.pipeline_mode<synchronous>, transform_indices = @transform_8, window_bounds = array<i64: 1, 128>}, {transform_indices = @transform_9, window_bounds = array<i64: 16, 128>}]} {
    %c0 = arith.constant 0 : index
    %c0_0 = arith.constant 0 : index
    %0 = vector.load %arg1[%c0, %c0_0] : memref<16x128xbf16, #tpu.memory_space<vmem>>, vector<16x128xbf16>
    %c0_1 = arith.constant 0 : index
    %c0_2 = arith.constant 0 : index
    %1 = vector.load %arg2[%c0_1, %c0_2] : memref<128x128xbf16, #tpu.memory_space<vmem>>, vector<128x128xbf16>
    %cst = arith.constant dense<0.000000e+00> : vector<16x128xf32>
    %2 = tpu.matmul %0, %1, %cst {dimension_numbers = #tpu.dot_dimension_numbers<[1], [0], [0], [1], [0, 0, 1, 1], [], []>} : vector<16x128xbf16>, vector<128x128xbf16>, vector<16x128xf32> -> vector<16x128xf32>
    %c0_3 = arith.constant 0 : index
    %c0_4 = arith.constant 0 : index
    %3 = vector.load %arg3[%c0_3, %c0_4] : memref<1x128xf32, #tpu.memory_space<vmem>>, vector<1x128xf32>
    %4 = vector.broadcast %3 : vector<1x128xf32> to vector<16x128xf32>
    %5 = arith.addf %2, %4 : vector<16x128xf32>
    %6 = arith.truncf %5 : vector<16x128xf32> to vector<16x128xbf16>
    %c0_5 = arith.constant 0 : index
    %c0_6 = arith.constant 0 : index
    %7 = vector.load %arg4[%c0_5, %c0_6] : memref<128x128xbf16, #tpu.memory_space<vmem>>, vector<128x128xbf16>
    %cst_7 = arith.constant dense<0.000000e+00> : vector<16x128xf32>
    %8 = tpu.matmul %6, %7, %cst_7 {dimension_numbers = #tpu.dot_dimension_numbers<[1], [0], [0], [1], [0, 0, 1, 1], [], []>} : vector<16x128xbf16>, vector<128x128xbf16>, vector<16x128xf32> -> vector<16x128xf32>
    %c0_8 = arith.constant 0 : index
    %c0_9 = arith.constant 0 : index
    %9 = vector.load %arg5[%c0_8, %c0_9] : memref<1x128xf32, #tpu.memory_space<vmem>>, vector<1x128xf32>
    %10 = vector.broadcast %9 : vector<1x128xf32> to vector<16x128xf32>
    %11 = arith.addf %8, %10 : vector<16x128xf32>
    %cst_10 = arith.constant 0.000000e+00 : f32
    %12 = vector.broadcast %cst_10 : f32 to vector<16x128xf32>
    %13 = arith.maximumf %11, %12 : vector<16x128xf32>
    %14 = arith.truncf %13 : vector<16x128xf32> to vector<16x128xbf16>
    %c0_11 = arith.constant 0 : index
    %c0_12 = arith.constant 0 : index
    %15 = vector.load %arg6[%c0_11, %c0_12] : memref<128x128xbf16, #tpu.memory_space<vmem>>, vector<128x128xbf16>
    %cst_13 = arith.constant dense<0.000000e+00> : vector<16x128xf32>
    %16 = tpu.matmul %14, %15, %cst_13 {dimension_numbers = #tpu.dot_dimension_numbers<[1], [0], [0], [1], [0, 0, 1, 1], [], []>} : vector<16x128xbf16>, vector<128x128xbf16>, vector<16x128xf32> -> vector<16x128xf32>
    %c0_14 = arith.constant 0 : index
    %c0_15 = arith.constant 0 : index
    %17 = vector.load %arg7[%c0_14, %c0_15] : memref<1x128xf32, #tpu.memory_space<vmem>>, vector<1x128xf32>
    %18 = vector.broadcast %17 : vector<1x128xf32> to vector<16x128xf32>
    %19 = arith.addf %16, %18 : vector<16x128xf32>
    %20 = arith.truncf %19 : vector<16x128xf32> to vector<16x128xbf16>
    %c0_16 = arith.constant 0 : index
    %c0_17 = arith.constant 0 : index
    %21 = vector.load %arg8[%c0_16, %c0_17] : memref<128x128xbf16, #tpu.memory_space<vmem>>, vector<128x128xbf16>
    %cst_18 = arith.constant dense<0.000000e+00> : vector<16x128xf32>
    %22 = tpu.matmul %20, %21, %cst_18 {dimension_numbers = #tpu.dot_dimension_numbers<[1], [0], [0], [1], [0, 0, 1, 1], [], []>} : vector<16x128xbf16>, vector<128x128xbf16>, vector<16x128xf32> -> vector<16x128xf32>
    %c0_19 = arith.constant 0 : index
    %c0_20 = arith.constant 0 : index
    %23 = vector.load %arg9[%c0_19, %c0_20] : memref<1x128xf32, #tpu.memory_space<vmem>>, vector<1x128xf32>
    %24 = vector.broadcast %23 : vector<1x128xf32> to vector<16x128xf32>
    %25 = arith.addf %22, %24 : vector<16x128xf32>
    %c0_21 = arith.constant 0 : index
    %c0_22 = arith.constant 0 : index
    %26 = vector.load %arg10[%c0_21, %c0_22] : memref<16x128xf32, #tpu.memory_space<vmem>>, vector<16x128xf32>
    tpu.vector_store %arg10[%c0_21, %c0_22], %25 {strides = array<i32>} : memref<16x128xf32, #tpu.memory_space<vmem>>, vector<16x128xf32>,
    return
  }
  func.func @transform_0(%arg0: i32) -> (i32, i32) {
    %c0_i32 = arith.constant 0 : i32
    %c0_i32_0 = arith.constant 0 : i32
    return %arg0, %c0_i32 : i32, i32
  }
  func.func @transform_1(%arg0: i32) -> (i32, i32) {
    %c0_i32 = arith.constant 0 : i32
    %c0_i32_0 = arith.constant 0 : i32
    %c0_i32_1 = arith.constant 0 : i32
    return %c0_i32, %c0_i32_0 : i32, i32
  }
  func.func @transform_2(%arg0: i32) -> (i32, i32) {
    %c0_i32 = arith.constant 0 : i32
    %c0_i32_0 = arith.constant 0 : i32
    %c0_i32_1 = arith.constant 0 : i32
    return %c0_i32, %c0_i32_0 : i32, i32
  }
  func.func @transform_3(%arg0: i32) -> (i32, i32) {
    %c0_i32 = arith.constant 0 : i32
    %c0_i32_0 = arith.constant 0 : i32
    %c0_i32_1 = arith.constant 0 : i32
    return %c0_i32, %c0_i32_0 : i32, i32
  }
  func.func @transform_4(%arg0: i32) -> (i32, i32) {
    %c0_i32 = arith.constant 0 : i32
    %c0_i32_0 = arith.constant 0 : i32
    %c0_i32_1 = arith.constant 0 : i32
    return %c0_i32, %c0_i32_0 : i32, i32
  }
  func.func @transform_5(%arg0: i32) -> (i32, i32) {
    %c0_i32 = arith.constant 0 : i32
    %c0_i32_0 = arith.constant 0 : i32
    %c0_i32_1 = arith.constant 0 : i32
    return %c0_i32, %c0_i32_0 : i32, i32
  }
  func.func @transform_6(%arg0: i32) -> (i32, i32) {
    %c0_i32 = arith.constant 0 : i32
    %c0_i32_0 = arith.constant 0 : i32
    %c0_i32_1 = arith.constant 0 : i32
    return %c0_i32, %c0_i32_0 : i32, i32
  }
  func.func @transform_7(%arg0: i32) -> (i32, i32) {
    %c0_i32 = arith.constant 0 : i32
    %c0_i32_0 = arith.constant 0 : i32
    %c0_i32_1 = arith.constant 0 : i32
    return %c0_i32, %c0_i32_0 : i32, i32
  }
  func.func @transform_8(%arg0: i32) -> (i32, i32) {
    %c0_i32 = arith.constant 0 : i32
    %c0_i32_0 = arith.constant 0 : i32
    %c0_i32_1 = arith.constant 0 : i32
    return %c0_i32, %c0_i32_0 : i32, i32
  }
  func.func @transform_9(%arg0: i32) -> (i32, i32) {
    %c0_i32 = arith.constant 0 : i32
    %c0_i32_0 = arith.constant 0 : i32
    return %arg0, %c0_i32 : i32, i32
  }
}

</mosaic_0001>

<bundles_post_ra>
// kernel: tpu_custom_call.1
= control target key start
LH: loop header
LB: loop body
LE: loop exit
PB: predicated region body
PF: predicated region fallthrough
CT: control target
= control target key end

     0   :  { %14 = vsyncpa [#allocation3], 0  ;;  %s1137_s0 = inlined_call_operand.hbm [shape: bf16[16,128], index: 0, kind: input, shape index: {}]   ;;  %s1138_s1 = inlined_call_operand.hbm [shape: bf16[128,128], index: 1, kind: input, shape index: {}]   ;;  %s1139_s2 = inlined_call_operand.vmem [shape: f32[1,128], index: 2, kind: input, shape index: {}]   ;;  %s1140_s3 = inlined_call_operand.hbm [shape: bf16[128,128], index: 3, kind: input, shape index: {}]   ;;  %s1141_s4 = inlined_call_operand.vmem [shape: f32[1,128], index: 4, kind: input, shape index: {}]   ;;  %s1142_s5 = inlined_call_operand.hbm [shape: bf16[128,128], index: 5, kind: input, shape index: {}]   ;;  %s1143_s6 = inlined_call_operand.vmem [shape: f32[1,128], index: 6, kind: input, shape index: {}]   ;;  %s1144_s7 = inlined_call_operand.hbm [shape: bf16[128,128], index: 7, kind: input, shape index: {}]   ;;  %s1145_s8 = inlined_call_operand.vmem [shape: f32[1,128], index: 8, kind: input, shape index: {}]   ;;  %s1146_s9 = inlined_call_operand.hbm [shape: f32[16,128], index: 9, kind: output, shape index: {}]  }
   0x1   :  { %15 = vsyncpa [#allocation6], 0 }
   0x2   :  { %16 = vsyncpa [#allocation9], 0 }
   0x3   :  { %17 = vsyncpa [#allocation4], 0  ;;  %s922_s30 = smov [#allocation5]   ;;  %s923_s11 = smov [#allocation8]  }
   0x4   :  { %s35_s10 = sshll.u32 %s922_s30, 4  ;;  %s63_s12 = sshll.u32 %s923_s11, 4  ;;  %s36_s10 = int_to_ptr.vmem [resolvable:$true] %s35_s10  ;;  %s984_s12 = int_to_ptr.vmem [resolvable:$true] %s63_s12 }
   0x5   :  { %s782_s15 = scalar_lea.hbm %s1138_s1, 1024 }
   0x6   :  { %p783_p0 = scmp.ne.s32.totalorder %s1138_s1, %s782_s15  ;;  %p786_p1 = scmp.lt.u32.totalorder %s782_s15, %s1138_s1 }
   0x8   :  { %p788_p2 = pnand %p786_p1, %p783_p0 }
   0xa   :  { %791 = shalt.err (!%p788_p2)
}
   0xb   :  { %s792_s20 = scalar_lea.vmem %s36_s10, 1024  ;;  %p797_p4 = scmp.lt.s32.totalorder %s36_s10, %s36_s10 }
   0xc   :  { %p793_p3 = scmp.ne.s32.totalorder %s36_s10, %s792_s20  ;;  %p798_p5 = scmp.lt.s32.totalorder %s792_s20, %s792_s20 }
   0xe   :  { %p799_p6 = por %p798_p5, %p797_p4 }
  0x10   :  { %p800_p7 = pnand %p799_p6, %p793_p3 }
  0x12   :  { %803 = shalt.err (!%p800_p7)
}
  0x13   :  { %s924_s21 = smov 64   ;;  %s925_s22 = smov 4  }
  0x14   :  { %41 = dma.hbm_to_vmem [thread:$0]  %s1138_s1, 1024, %s36_s10, [#allocation6], %s924_s21, %s924_s21, %s925_s22  }
  0x15   :  { %s804_s27 = scalar_lea.hbm %s1142_s5, 1024 }
  0x16   :  { %p805_p8 = scmp.ne.s32.totalorder %s1142_s5, %s804_s27  ;;  %p808_p9 = scmp.lt.u32.totalorder %s804_s27, %s1142_s5 }
  0x18   :  { %p810_p10 = pnand %p808_p9, %p805_p8 }
  0x1a   :  { %813 = shalt.err (!%p810_p10)
}
  0x1b   :  { %s814_s13 = scalar_lea.vmem %s984_s12, 1024  ;;  %p819_p12 = scmp.lt.s32.totalorder %s984_s12, %s984_s12 }
  0x1c   :  { %p815_p11 = scmp.ne.s32.totalorder %s984_s12, %s814_s13  ;;  %p820_p13 = scmp.lt.s32.totalorder %s814_s13, %s814_s13 }
  0x1e   :  { %p821_p0 = por %p820_p13, %p819_p12 }
  0x20   :  { %p822_p1 = pnand %p821_p0, %p815_p11 }
  0x22   :  { %825 = shalt.err (!%p822_p1)
}
  0x23   :  { %69 = dma.hbm_to_vmem [thread:$0]  %s1142_s5, 1024, %s984_s12, [#allocation9], %s924_s21, %s924_s21, %s925_s22  }
  0x24   :  { %s926_s14 = smov [#allocation2]   ;;  %s927_s16 = smov [#allocation7]  }
  0x25   :  { %s23_s15 = sshll.u32 %s926_s14, 4  ;;  %s49_s17 = sshll.u32 %s927_s16, 4  ;;  %s24_s15 = int_to_ptr.vmem [resolvable:$true] %s23_s15  ;;  %s1021_s17 = int_to_ptr.vmem [resolvable:$true] %s49_s17 }
  0x26   :  { %s826_s20 = scalar_lea.hbm %s1137_s0, 128 }
  0x27   :  { %p827_p2 = scmp.ne.s32.totalorder %s1137_s0, %s826_s20  ;;  %p830_p3 = scmp.lt.u32.totalorder %s826_s20, %s1137_s0 }
  0x29   :  { %p832_p4 = pnand %p830_p3, %p827_p2 }
  0x2b   :  { %835 = shalt.err (!%p832_p4)
}
  0x2c   :  { %s836_s5 = scalar_lea.vmem %s24_s15, 128  ;;  %p841_p6 = scmp.lt.s32.totalorder %s24_s15, %s24_s15 }
  0x2d   :  { %p837_p5 = scmp.ne.s32.totalorder %s24_s15, %s836_s5  ;;  %p842_p7 = scmp.lt.s32.totalorder %s836_s5, %s836_s5 }
  0x2f   :  { %p843_p8 = por %p842_p7, %p841_p6 }
  0x31   :  { %p844_p9 = pnand %p843_p8, %p837_p5 }
  0x33   :  { %847 = shalt.err (!%p844_p9)
}
  0x34   :  { %29 = dma.hbm_to_vmem [thread:$0]  %s1137_s0, 128, %s24_s15, [#allocation3], %s924_s21, %s924_s21, %s925_s22  }
  0x35   :  { %s848_s30 = scalar_lea.hbm %s1140_s3, 1024 }
  0x36   :  { %p849_p10 = scmp.ne.s32.totalorder %s1140_s3, %s848_s30  ;;  %p852_p11 = scmp.lt.u32.totalorder %s848_s30, %s1140_s3 }
  0x38   :  { %p854_p12 = pnand %p852_p11, %p849_p10 }
  0x3a   :  { %857 = shalt.err (!%p854_p12)
}
  0x3b   :  { %s858_s14 = scalar_lea.vmem %s1021_s17, 1024  ;;  %p863_p0 = scmp.lt.s32.totalorder %s1021_s17, %s1021_s17 }
  0x3c   :  { %p859_p13 = scmp.ne.s32.totalorder %s1021_s17, %s858_s14  ;;  %p864_p1 = scmp.lt.s32.totalorder %s858_s14, %s858_s14 }
  0x3e   :  { %p865_p2 = por %p864_p1, %p863_p0 }
  0x40   :  { %p866_p3 = pnand %p865_p2, %p859_p13 }
  0x42   :  { %869 = shalt.err (!%p866_p3)
}
  0x43   :  { %55 = dma.hbm_to_vmem [thread:$0]  %s1140_s3, 1024, %s1021_s17, [#allocation6], %s924_s21, %s924_s21, %s925_s22  }
  0x44   :  { %s928_s16 = smov [#allocation10]   ;;  %s870_s23 = scalar_lea.hbm %s1144_s7, 1024 }
  0x45   :  { %s77_s18 = sshll.u32 %s928_s16, 4  ;;  %p871_p4 = scmp.ne.s32.totalorder %s1144_s7, %s870_s23  ;;  %s78_s18 = int_to_ptr.vmem [resolvable:$true] %s77_s18 }
  0x46   :  { %p874_p5 = scmp.lt.u32.totalorder %s870_s23, %s1144_s7 }
  0x48   :  { %p876_p6 = pnand %p874_p5, %p871_p4 }
  0x4a   :  { %879 = shalt.err (!%p876_p6)
}
  0x4b   :  { %s880_s12 = scalar_lea.vmem %s78_s18, 1024  ;;  %p885_p8 = scmp.lt.s32.totalorder %s78_s18, %s78_s18 }
  0x4c   :  { %p881_p7 = scmp.ne.s32.totalorder %s78_s18, %s880_s12  ;;  %p886_p9 = scmp.lt.s32.totalorder %s880_s12, %s880_s12 }
  0x4e   :  { %p887_p10 = por %p886_p9, %p885_p8 }
  0x50   :  { %p888_p11 = pnand %p887_p10, %p881_p7 }
  0x52   :  { %891 = shalt.err (!%p888_p11)
}
  0x53   :  { %83 = dma.hbm_to_vmem [thread:$0]  %s1144_s7, 1024, %s78_s18, [#allocation9], %s924_s21, %s924_s21, %s925_s22  }
  0x54   :  { %914 = dma.done.wait [#allocation3], 128  }
  0x55   :  { %915 = vsyncadd [#allocation3], 4294967168 }
  0x56   :  { %916 = dma.done.wait [#allocation6], 2048  }
  0x57   :  { %917 = vsyncadd [#allocation6], 4294965248 }
  0x58   :  { %918 = dma.done.wait [#allocation9], 2048  }
  0x59   :  { %919 = vsyncadd [#allocation9], 4294965248  ;;  %v929_v0 = vmov 0.0   ;;  %vm930_vm0 = vmmov 0   ;;  %v749_v1 = vld [vmem:[#allocation5] sm:$0xff]   ;;  %v750_v2 = vld [vmem:[#allocation5 + $0x8] sm:$0xff]  }
  0x5a   :  { %657 = vmatprep.subr.bf16.mxu0 %v929_v0  ;;  %673 = vmatprep.mubr.msk.bf16.mxu0 %vm930_vm0, %v929_v0  ;;  %v751_v3 = vld [vmem:[#allocation5 + $0x10] sm:$0xff]   ;;  %v758_v4 = vld [vmem:[#allocation7] sm:$0xff]   ;;  %v752_v5 = vld [vmem:[#allocation5 + $0x18] sm:$0xff]   ;;  %s931_s30 = smov [#allocation11]  }
  0x5b   :  { %677 = vmatprep.subr.bf16.mxu1 %v929_v0  ;;  %693 = vmatprep.mubr.msk.bf16.mxu1 %vm930_vm0, %v929_v0  ;;  %v759_v6 = vld [vmem:[#allocation7 + $0x8] sm:$0xff]   ;;  %v753_v7 = vld [vmem:[#allocation5 + $0x20] sm:$0xff]   ;;  %v760_v8 = vld [vmem:[#allocation7 + $0x10] sm:$0xff]   ;;  %s570_s11 = sshll.u32 %s931_s30, 4  ;;  %s571_s11 = int_to_ptr.vmem [resolvable:$true] %s570_s11 }
  0x5c   :  { %658 = vmatpush3.bf16.msra.mxu0 %v749_v1  ;;  %678 = vmatpush3.bf16.msra.mxu1 %v758_v4  ;;  %v754_v9 = vld [vmem:[#allocation5 + $0x28] sm:$0xff]   ;;  %v761_v10 = vld [vmem:[#allocation7 + $0x18] sm:$0xff]   ;;  %v755_v11 = vld [vmem:[#allocation5 + $0x30] sm:$0xff]   ;;  %p897_p13 = scmp.lt.s32.totalorder %s571_s11, %s571_s11 }
  0x5d   :  { %659 = vmatprep.subr.bf16.mxu0 %v929_v0  ;;  %679 = vmatprep.subr.bf16.mxu1 %v929_v0  ;;  %v762_v12 = vld [vmem:[#allocation7 + $0x20] sm:$0xff]   ;;  %v756_v13 = vld [vmem:[#allocation5 + $0x38] sm:$0xff]   ;;  %v763_v14 = vld [vmem:[#allocation7 + $0x28] sm:$0xff]  }
  0x5e   :  { %v757_v15 = vld [vmem:[#allocation2] sm:$0xff]   ;;  %v764_v16 = vld [vmem:[#allocation7 + $0x30] sm:$0xff]   ;;  %v766_v18 = vld [vmem:[#allocation8] sm:$0xff]  }
  0x5f   :  { %v765_v17 = vld [vmem:[#allocation7 + $0x38] sm:$0xff]   ;;  %v767_v19 = vld [vmem:[#allocation8 + $0x8] sm:$0xff]   ;;  %v768_v20 = vld [vmem:[#allocation8 + $0x10] sm:$0xff]  }
  0x60   :  { %660 = vmatpush3.bf16.msra.mxu0 %v750_v2  ;;  %680 = vmatpush3.bf16.msra.mxu1 %v759_v6  ;;  %v769_v21 = vld [vmem:[#allocation8 + $0x18] sm:$0xff]   ;;  %v770_v22 = vld [vmem:[#allocation8 + $0x20] sm:$0xff]   ;;  %v771_v23 = vld [vmem:[#allocation8 + $0x28] sm:$0xff]  }
  0x61   :  { %661 = vmatprep.subr.bf16.mxu0 %v929_v0  ;;  %681 = vmatprep.subr.bf16.mxu1 %v929_v0  ;;  %v584_v24 = vld [vmem:[%s1139_s2] ss:$0 sm:$0xff]  ;;  %v772_v32 = vld [vmem:[#allocation8 + $0x30] sm:$0xff]   ;;  %v774_v34 = vld [vmem:[#allocation10] sm:$0xff]  }
  0x62   :  { %v773_v33 = vld [vmem:[#allocation8 + $0x38] sm:$0xff]   ;;  %v775_v35 = vld [vmem:[#allocation10 + $0x8] sm:$0xff]   ;;  %v776_v36 = vld [vmem:[#allocation10 + $0x10] sm:$0xff]  }
  0x63   :  { %v777_v37 = vld [vmem:[#allocation10 + $0x18] sm:$0xff]   ;;  %v778_v38 = vld [vmem:[#allocation10 + $0x20] sm:$0xff]   ;;  %v779_v39 = vld [vmem:[#allocation10 + $0x28] sm:$0xff]  }
  0x64   :  { %662 = vmatpush3.bf16.msra.mxu0 %v751_v3  ;;  %682 = vmatpush3.bf16.msra.mxu1 %v760_v8  ;;  %v594_v40 = vld [vmem:[%s1141_s4] ss:$0 sm:$0xff]  ;;  %v780_v50 = vld [vmem:[#allocation10 + $0x30] sm:$0xff]  }
  0x65   :  { %663 = vmatprep.subr.bf16.mxu0 %v929_v0  ;;  %683 = vmatprep.subr.bf16.mxu1 %v929_v0  ;;  %v781_v51 = vld [vmem:[#allocation10 + $0x38] sm:$0xff]  }
  0x66   :  { %v603_v52 = vld [vmem:[%s1143_s6] ss:$0 sm:$0xff]  ;;  %s892_s6 = scalar_lea.vmem %s571_s11, 256 }
  0x67   :  { %v612_v60 = vld [vmem:[%s1145_s8] ss:$0 sm:$0xff]  ;;  %p893_p12 = scmp.ne.s32.totalorder %s571_s11, %s892_s6  ;;  %p898_p0 = scmp.lt.s32.totalorder %s892_s6, %s892_s6 }
  0x68   :  { %664 = vmatpush3.bf16.msra.mxu0 %v752_v5  ;;  %684 = vmatpush3.bf16.msra.mxu1 %v761_v10 }
  0x69   :  { %665 = vmatprep.subr.bf16.mxu0 %v929_v0  ;;  %685 = vmatprep.subr.bf16.mxu1 %v929_v0  ;;  %p899_p1 = por %p898_p0, %p897_p13 }
  0x6b   :  { %p900_p2 = pnand %p899_p1, %p893_p12 }
  0x6c   :  { %666 = vmatpush3.bf16.msra.mxu0 %v753_v7  ;;  %686 = vmatpush3.bf16.msra.mxu1 %v762_v12 }
  0x6d   :  { %667 = vmatprep.subr.bf16.mxu0 %v929_v0  ;;  %687 = vmatprep.subr.bf16.mxu1 %v929_v0 }
  0x70   :  { %668 = vmatpush3.bf16.msra.mxu0 %v754_v9  ;;  %688 = vmatpush3.bf16.msra.mxu1 %v763_v14 }
  0x71   :  { %669 = vmatprep.subr.bf16.mxu0 %v929_v0  ;;  %689 = vmatprep.subr.bf16.mxu1 %v929_v0 }
  0x74   :  { %670 = vmatpush3.bf16.msra.mxu0 %v755_v11  ;;  %690 = vmatpush3.bf16.msra.mxu1 %v764_v16 }
  0x75   :  { %671 = vmatprep.subr.bf16.mxu0 %v929_v0  ;;  %691 = vmatprep.subr.bf16.mxu1 %v929_v0 }
  0x78   :  { %672 = vmatpush3.bf16.msra.mxu0 %v756_v13  ;;  %692 = vmatpush3.bf16.msra.mxu1 %v765_v17 }
  0x79   :  { %697 = vmatprep.subr.bf16.mxu0 %v929_v0  ;;  %717 = vmatprep.subr.bf16.mxu1 %v929_v0 }
  0x7b   :  { %674 = vmatmul.mubr.bf16.vlgmr.msra.gmra.mrb[0].mxu0 %v757_v15 }
  0x7c   :  { %713 = vmatprep.mubr.msk.bf16.mxu0 %vm930_vm0, %v929_v0  ;;  %698 = vmatpush3.bf16.msra.mxu0 %v766_v18 }
  0x7d   :  { %699 = vmatprep.subr.bf16.mxu0 %v929_v0 }
  0x80   :  { %700 = vmatpush3.bf16.msra.mxu0 %v767_v19 }
  0x81   :  { %701 = vmatprep.subr.bf16.mxu0 %v929_v0 }
  0x84   :  { %702 = vmatpush3.bf16.msra.mxu0 %v768_v20 }
  0x85   :  { %703 = vmatprep.subr.bf16.mxu0 %v929_v0 }
  0x88   :  { %704 = vmatpush3.bf16.msra.mxu0 %v769_v21 }
  0x89   :  { %705 = vmatprep.subr.bf16.mxu0 %v929_v0 }
  0x8c   :  { %706 = vmatpush3.bf16.msra.mxu0 %v770_v22 }
  0x8d   :  { %707 = vmatprep.subr.bf16.mxu0 %v929_v0 }
  0x90   :  { %708 = vmatpush3.bf16.msra.mxu0 %v771_v23 }
  0x91   :  { %709 = vmatprep.subr.bf16.mxu0 %v929_v0 }
  0x94   :  { %710 = vmatpush3.bf16.msra.mxu0 %v772_v32 }
  0x95   :  { %711 = vmatprep.subr.bf16.mxu0 %v929_v0 }
  0x98   :  { %712 = vmatpush3.bf16.msra.mxu0 %v773_v33 }
 0x14e   :  { %v215_v25 = vpop.f32.mrb[0].mxu0 }
 0x14f   :  { %v675_v26 = vpop.f32.mrb[1].mxu0  ;;  %v216_v28 = vadd.f32 %v584_v24, %v215_v25 }
 0x150   :  { %v218_v27 = vpop.f32.mrb[2].mxu0 }
 0x151   :  { %v219_v29 = vadd.f32 %v584_v24, %v218_v27  ;;  %v676_v30 = vpop.f32.mrb[3].mxu0 }
 0x153   :  { %v222_v31 = vpack.c.bf16 %v219_v29, %v216_v28 }
 0x155   :  { %694 = vmatmul.mubr.bf16.vlgmr.msra.gmra.mrb[0].mxu1 %v222_v31 }
 0x156   :  { %733 = vmatprep.mubr.msk.bf16.mxu1 %vm930_vm0, %v929_v0  ;;  %718 = vmatpush3.bf16.msra.mxu1 %v774_v34 }
 0x157   :  { %719 = vmatprep.subr.bf16.mxu1 %v929_v0 }
 0x15a   :  { %720 = vmatpush3.bf16.msra.mxu1 %v775_v35 }
 0x15b   :  { %721 = vmatprep.subr.bf16.mxu1 %v929_v0 }
 0x15e   :  { %722 = vmatpush3.bf16.msra.mxu1 %v776_v36 }
 0x15f   :  { %723 = vmatprep.subr.bf16.mxu1 %v929_v0 }
 0x162   :  { %724 = vmatpush3.bf16.msra.mxu1 %v777_v37 }
 0x163   :  { %725 = vmatprep.subr.bf16.mxu1 %v929_v0 }
 0x166   :  { %726 = vmatpush3.bf16.msra.mxu1 %v778_v38 }
 0x167   :  { %727 = vmatprep.subr.bf16.mxu1 %v929_v0 }
 0x16a   :  { %728 = vmatpush3.bf16.msra.mxu1 %v779_v39 }
 0x16b   :  { %729 = vmatprep.subr.bf16.mxu1 %v929_v0 }
 0x16e   :  { %730 = vmatpush3.bf16.msra.mxu1 %v780_v50 }
 0x16f   :  { %731 = vmatprep.subr.bf16.mxu1 %v929_v0 }
 0x172   :  { %732 = vmatpush3.bf16.msra.mxu1 %v781_v51 }
 0x228   :  { %v328_v41 = vpop.f32.mrb[0].mxu1 }
 0x229   :  { %v329_v42 = vadd.f32 %v594_v40, %v328_v41  ;;  %v695_v43 = vpop.f32.mrb[1].mxu1 }
 0x22a   :  { %v331_v44 = vpop.f32.mrb[2].mxu1 }
 0x22b   :  { %v332_v45 = vadd.f32 %v594_v40, %v331_v44  ;;  %v696_v46 = vpop.f32.mrb[3].mxu1  ;;  %v335_v47 = vmax.f32 %v329_v42, 0.0 }
 0x22d   :  { %v336_v48 = vmax.f32 %v332_v45, 0.0 }
 0x22f   :  { %v337_v49 = vpack.c.bf16 %v336_v48, %v335_v47 }
 0x231   :  { %714 = vmatmul.mubr.bf16.vlgmr.msra.gmra.mrb[4].mxu0 %v337_v49 }
 0x304   :  { %v443_v53 = vpop.f32.mrb[4].mxu0 }
 0x305   :  { %v715_v54 = vpop.f32.mrb[5].mxu0  ;;  %v444_v56 = vadd.f32 %v603_v52, %v443_v53 }
 0x306   :  { %v446_v55 = vpop.f32.mrb[6].mxu0 }
 0x307   :  { %v447_v57 = vadd.f32 %v603_v52, %v446_v55  ;;  %v716_v58 = vpop.f32.mrb[7].mxu0 }
 0x309   :  { %v450_v59 = vpack.c.bf16 %v447_v57, %v444_v56 }
 0x30b   :  { %734 = vmatmul.mubr.bf16.vlgmr.msra.gmra.mrb[4].mxu1 %v450_v59 }
 0x3de   :  { %v556_v61 = vpop.f32.mrb[4].mxu1 }
 0x3df   :  { %v557_v62 = vadd.f32 %v612_v60, %v556_v61  ;;  %v735_v63 = vpop.f32.mrb[5].mxu1 }
 0x3e0   :  { %v559_v0 = vpop.f32.mrb[6].mxu1 }
 0x3e1   :  { %563 = vst [vmem:[#allocation11] sm:$0xff] %v557_v62  ;;  %v560_v1 = vadd.f32 %v612_v60, %v559_v0  ;;  %v736_v2 = vpop.f32.mrb[7].mxu1 }
 0x3e3   :  { %564 = vst [vmem:[#allocation11 + $0x8] sm:$0xff] %v560_v1 }
 0x3e4   :  { %903 = shalt.err (!%p900_p2)
}
 0x3e5   :  { %s904_s1 = scalar_lea.hbm %s1146_s9, 256 }
 0x3e6   :  { %p905_p3 = scmp.ne.s32.totalorder %s1146_s9, %s904_s1  ;;  %p908_p4 = scmp.lt.u32.totalorder %s904_s1, %s1146_s9 }
 0x3e8   :  { %p910_p5 = pnand %p908_p4, %p905_p3 }
 0x3ea   :  { %913 = shalt.err (!%p910_p5)
}
 0x3eb   :  { %s932_s16 = smov 128   ;;  %s933_s18 = smov 8  }
 0x3ec   :  { %576 = dma.vmem_to_hbm [thread:$0]  %s571_s11, 256, %s1146_s9, [#allocation4], %s932_s16, %s932_s16, %s933_s18  }
 0x3ed   :  { %920 = dma.done.wait [#allocation4], 256  }
 0x3ee   :  { %921 = vsyncadd [#allocation4], 4294967040 }
 0x3ef   :  { %580 = vsyncpa [#allocation3], 1 }
 0x3f0   :  { %581 = vsyncpa [#allocation6], 1 }
 0x3f1   :  { %582 = vsyncpa [#allocation9], 1 }
 0x3f2   :  { %583 = vsyncpa [#allocation4], 1 }

</bundles_post_ra>
